<compile_context>
chip_gen: v7x
topology: tpu7x:2x2x1
jax: 0.10.0
libtpu: 0.0.40
codegen_flags: <defaults>
</compile_context>

<pallas_src>
import functools
import math

import jax
import jax.numpy as jnp
from jax.experimental import pallas as pl
from jax.experimental.pallas import tpu as pltpu


def _round_up(x, m):
    return ((x + m - 1) // m) * m


def _lgconv_kernel(adj_ref, x_ref, dcol_ref, drow_ref, acc_in_ref,
                   y_ref, acc_out_ref, *, scale):
    """One (row-tile, k-tile) step of

         y       = drow * (A @ (dcol * x))          # LGConv with fused gcn_norm
         acc_out = (acc_in + y) * scale             # fused running layer sum

    adj_ref    : (tm, tk)  bf16, exact 0/1 adjacency tile (streamed)
    x_ref      : (tk, Dp)  f32 embeddings tile
    dcol_ref   : (tk, 1)   f32 column-side 1/sqrt(deg)
    drow_ref   : (tm, 1)   f32 row-side    1/sqrt(deg)
    acc_in_ref : (tm, Dp)  f32 running sum of previous layer embeddings
    y_ref      : (tm, Dp)  f32 output tile, resident across k (accumulator)
    acc_out_ref: (tm, Dp)  f32 updated running sum (written at last k)
    """
    k = pl.program_id(1)

    @pl.when(k == 0)
    def _():
        y_ref[...] = jnp.zeros_like(y_ref)

    # Column-side degree scaling of this k-slab of x (cheap VPU work, hidden
    # under the adjacency DMA / MXU).
    xs = x_ref[...] * dcol_ref[...]                                    # (tk, Dp)

    # bf16x2 split: adjacency is exactly representable in bf16 (0/1), so
    # A @ hi + A @ lo runs two native-rate bf16 MXU matmuls with f32
    # accumulation and ~2^-18 relative error vs an f32 matmul.
    hi = xs.astype(jnp.bfloat16)
    lo = (xs - hi.astype(jnp.float32)).astype(jnp.bfloat16)
    a = adj_ref[...]
    y_ref[...] += (jnp.dot(a, hi, preferred_element_type=jnp.float32)
                   + jnp.dot(a, lo, preferred_element_type=jnp.float32))

    @pl.when(k == pl.num_programs(1) - 1)
    def _():
        y = y_ref[...] * drow_ref[...]
        y_ref[...] = y
        acc_out_ref[...] = (acc_in_ref[...] + y) * scale


def _lgconv(adj_bf16, dinv, x, acc, *, scale, tm, tk):
    """One LGConv layer + fused running-sum update, tiled over (rows, k)."""
    Np, Dp = x.shape
    grid = (Np // tm, Np // tk)

    # Derived VMEM budget: double-buffered input/output tiles, with headroom;
    # capped at 32 MiB so it is safe on v7x (64 MiB physical).
    tile_bytes = (
        2 * tm * tk * 2          # double-buffered bf16 adjacency tile
        + 2 * tk * Dp * 4        # double-buffered f32 x tile
        + 2 * (tk + tm) * 4      # double-buffered dinv tiles
        + 3 * 2 * tm * Dp * 4    # double-buffered y / acc_in / acc_out tiles
    )
    vmem_limit = min(max(2 * tile_bytes, 16 << 20), 32 << 20)

    kernel = functools.partial(_lgconv_kernel, scale=scale)
    return pl.pallas_call(
        kernel,
        out_shape=(jax.ShapeDtypeStruct((Np, Dp), jnp.float32),
                   jax.ShapeDtypeStruct((Np, Dp), jnp.float32)),
        grid_spec=pltpu.PrefetchScalarGridSpec(
            num_scalar_prefetch=0,
            grid=grid,
            in_specs=[
                pl.BlockSpec((tm, tk), lambda i, k: (i, k)),   # adjacency (bf16 0/1)
                pl.BlockSpec((tk, Dp), lambda i, k: (k, 0)),   # embeddings
                pl.BlockSpec((tk, 1), lambda i, k: (k, 0)),    # dinv for columns
                pl.BlockSpec((tm, 1), lambda i, k: (i, 0)),    # dinv for rows
                pl.BlockSpec((tm, Dp), lambda i, k: (i, 0)),   # running layer sum in
            ],
            out_specs=[
                pl.BlockSpec((tm, Dp), lambda i, k: (i, 0)),   # x_{l+1}
                pl.BlockSpec((tm, Dp), lambda i, k: (i, 0)),   # running layer sum out
            ],
        ),
        compiler_params=pltpu.CompilerParams(
            dimension_semantics=("parallel", "arbitrary"),
            vmem_limit_bytes=vmem_limit,
        ),
    )(adj_bf16, x, dinv, dinv, acc)


def lightgcn_forward(user_emb, item_emb, edge_index, num_layers, *, tm=1024, tk=512):
    """LightGCN forward: (user_embeddings (U, D), item_embeddings (I, D)).

    Args:
      user_emb:  (U, D) f32 user embedding table.
      item_emb:  (I, D) f32 item embedding table.
      edge_index: (2, E) int32 edges over the joint node index space [0, U+I).
      num_layers: number of LGConv layers.
      tm, tk: row / reduction tile sizes (tm % 8 == 0, tk % 128 == 0).
    """
    assert tm % 8 == 0 and tk % 128 == 0
    U, D = user_emb.shape
    I = item_emb.shape[0]
    N = U + I

    # Lane-dense embedding dim and tile-divisible node count (zero padding is
    # exact: padded rows/cols are all-zero and have dinv == 0).
    Dp = _round_up(D, 128)
    Np = _round_up(N, math.lcm(tm, tk))

    x0 = jnp.zeros((Np, Dp), jnp.float32)
    x0 = x0.at[:U, :D].set(user_emb.astype(jnp.float32))
    x0 = x0.at[U:N, :D].set(item_emb.astype(jnp.float32))

    # Dense 0/1 adjacency built directly in bf16 (0/1 is exact in bf16; no f32
    # adj_norm materialization).  .at[].set dedupes repeated edges, matching
    # the binary SparseTensor adjacency used by LGConv.
    row, col = edge_index[0], edge_index[1]
    adj_bf16 = jnp.zeros((Np, Np), dtype=jnp.bfloat16).at[row, col].set(1.0)

    # Symmetric gcn_norm without self-loops, kept in f32.
    deg = jnp.sum(adj_bf16, axis=1, dtype=jnp.float32)
    dinv = jnp.where(deg > 0, jax.lax.rsqrt(deg), 0.0).astype(jnp.float32)
    dinv = dinv.reshape(Np, 1)

    if num_layers == 0:
        final = x0[:N, :D]
        return final[:U], final[U:]

    # Layer loop in JAX; per-layer propagation + running-sum update is one
    # Pallas call.  The 1/(L+1) mean scale is folded into the last layer.
    x = x0
    acc = x0                    # running sum of layer embeddings (read-only here)
    for layer in range(num_layers):
        scale = 1.0 / float(num_layers + 1) if layer == num_layers - 1 else 1.0
        x, acc = _lgconv(adj_bf16, dinv, x, acc, scale=scale, tm=tm, tk=tk)

    final = acc[:N, :D]
    return final[:U], final[U:]


def _reference(user_emb, item_emb, edge_index, num_layers):
    """Pure-JAX f32 reference mirroring the PyTorch module."""
    U = user_emb.shape[0]
    N = U + item_emb.shape[0]
    x = jnp.concatenate([user_emb, item_emb], axis=0).astype(jnp.float32)
    row, col = edge_index[0], edge_index[1]
    adj = jnp.zeros((N, N), dtype=jnp.float32).at[row, col].set(1.0)
    deg = jnp.sum(adj, axis=1)
    dinv = jnp.where(deg > 0, jax.lax.rsqrt(deg), 0.0)
    adj_norm = dinv[:, None] * adj * dinv[None, :]
    layers = [x]
    for _ in range(num_layers):
        x = adj_norm @ x
        layers.append(x)
    final = jnp.mean(jnp.stack(layers, axis=1), axis=1)
    return final[:U], final[U:]


if __name__ == "__main__":
    # Small deterministic setup consistent with the module's __init__.
    num_users = 96
    num_items = 160
    embedding_dim = 64
    num_layers = 3

    key = jax.random.PRNGKey(0)
    k_u, k_i, k_e = jax.random.split(key, 3)

    # nn.init.normal_(std=0.1)
    user_emb = 0.1 * jax.random.normal(k_u, (num_users, embedding_dim), jnp.float32)
    item_emb = 0.1 * jax.random.normal(k_i, (num_items, embedding_dim), jnp.float32)

    # Synthetic bipartite user-item interactions, symmetrized (both directions),
    # indices in the joint [0, N) node space as LightGCN expects.
    num_interactions = 256
    ku, ki = jax.random.split(k_e)
    u = jax.random.randint(ku, (num_interactions,), 0, num_users)
    it = jax.random.randint(ki, (num_interactions,), 0, num_items) + num_users
    edge_index = jnp.stack(
        [jnp.concatenate([u, it]), jnp.concatenate([it, u])], axis=0
    ).astype(jnp.int32)

    # Small tiles here so the test exercises a real (2, 2) grid; production
    # sizes use the defaults (tm=1024, tk=512).
    user_out, item_out = lightgcn_forward(
        user_emb, item_emb, edge_index, num_layers, tm=128, tk=128
    )
    jax.block_until_ready((user_out, item_out))

    # Sanity check against the pure-JAX f32 reference.  Tolerance leaves room
    # for the bf16x2 activation split (~2^-18 relative representation error);
    # observed deviations are O(1e-6).
    ref_u, ref_i = _reference(user_emb, item_emb, edge_index, num_layers)
    assert user_out.shape == (num_users, embedding_dim)
    assert item_out.shape == (num_items, embedding_dim)
    assert jnp.allclose(user_out, ref_u, atol=3e-5, rtol=1e-3)
    assert jnp.allclose(item_out, ref_i, atol=3e-5, rtol=1e-3)

    print("KERNEL_OK")
</pallas_src>

<mosaic_0001>
module attributes {stable_mosaic.version = 11 : i64} {
  func.func @_lgconv_kernel(%arg0: i32, %arg1: i32, %arg2: memref<128x128xbf16, #tpu.memory_space<vmem>>, %arg3: memref<128x128xf32, #tpu.memory_space<vmem>>, %arg4: memref<128x1xf32, #tpu.memory_space<vmem>>, %arg5: memref<128x1xf32, #tpu.memory_space<vmem>>, %arg6: memref<128x128xf32, #tpu.memory_space<vmem>>, %arg7: memref<128x128xf32, #tpu.memory_space<vmem>>, %arg8: memref<128x128xf32, #tpu.memory_space<vmem>>) attributes {dimension_semantics = [#tpu.dimension_semantics<parallel>, #tpu.dimension_semantics<arbitrary>], iteration_bounds = array<i64: 2, 2>, scalar_prefetch = 0 : i64, scratch_operands = 0 : i64, tpu.core_type = #tpu.core_type<tc>, window_params = [{transform_indices = @transform_0, window_bounds = array<i64: 128, 128>}, {transform_indices = @transform_1, window_bounds = array<i64: 128, 128>}, {transform_indices = @transform_2, window_bounds = array<i64: 128, 1>}, {transform_indices = @transform_3, window_bounds = array<i64: 128, 1>}, {transform_indices = @transform_4, window_bounds = array<i64: 128, 128>}, {transform_indices = @transform_5, window_bounds = array<i64: 128, 128>}, {transform_indices = @transform_6, window_bounds = array<i64: 128, 128>}]} {
    %c0_i32 = arith.constant 0 : i32
    %0 = arith.cmpi eq, %arg1, %c0_i32 : i32
    %1 = arith.extui %0 : i1 to i32
    %c0_i32_0 = arith.constant 0 : i32
    %2 = arith.cmpi ne, %1, %c0_i32_0 : i32
    scf.if %2 {
      %cst_12 = arith.constant 0.000000e+00 : f32
      %21 = vector.broadcast %cst_12 : f32 to vector<128x128xf32>
      %c0_13 = arith.constant 0 : index
      %c0_14 = arith.constant 0 : index
      %22 = vector.load %arg7[%c0_13, %c0_14] : memref<128x128xf32, #tpu.memory_space<vmem>>, vector<128x128xf32>
      tpu.vector_store %arg7[%c0_13, %c0_14], %21 {strides = array<i32>} : memref<128x128xf32, #tpu.memory_space<vmem>>, vector<128x128xf32>,
    } else {
    }
    %c0 = arith.constant 0 : index
    %c0_1 = arith.constant 0 : index
    %3 = vector.load %arg3[%c0, %c0_1] : memref<128x128xf32, #tpu.memory_space<vmem>>, vector<128x128xf32>
    %c0_2 = arith.constant 0 : index
    %c0_3 = arith.constant 0 : index
    %4 = vector.load %arg4[%c0_2, %c0_3] : memref<128x1xf32, #tpu.memory_space<vmem>>, vector<128x1xf32>
    %5 = vector.broadcast %4 : vector<128x1xf32> to vector<128x128xf32>
    %6 = arith.mulf %3, %5 : vector<128x128xf32>
    %7 = arith.truncf %6 : vector<128x128xf32> to vector<128x128xbf16>
    %8 = arith.extf %7 : vector<128x128xbf16> to vector<128x128xf32>
    %9 = arith.subf %6, %8 : vector<128x128xf32>
    %10 = arith.truncf %9 : vector<128x128xf32> to vector<128x128xbf16>
    %c0_4 = arith.constant 0 : index
    %c0_5 = arith.constant 0 : index
    %11 = vector.load %arg2[%c0_4, %c0_5] : memref<128x128xbf16, #tpu.memory_space<vmem>>, vector<128x128xbf16>
    %c0_6 = arith.constant 0 : index
    %c0_7 = arith.constant 0 : index
    %12 = vector.load %arg7[%c0_6, %c0_7] : memref<128x128xf32, #tpu.memory_space<vmem>>, vector<128x128xf32>
    %cst = arith.constant dense<0.000000e+00> : vector<128x128xf32>
    %13 = tpu.matmul %11, %7, %cst {dimension_numbers = #tpu.dot_dimension_numbers<[1], [0], [0], [1], [0, 0, 1, 1], [], []>} : vector<128x128xbf16>, vector<128x128xbf16>, vector<128x128xf32> -> vector<128x128xf32>
    %cst_8 = arith.constant dense<0.000000e+00> : vector<128x128xf32>
    %14 = tpu.matmul %11, %10, %cst_8 {dimension_numbers = #tpu.dot_dimension_numbers<[1], [0], [0], [1], [0, 0, 1, 1], [], []>} : vector<128x128xbf16>, vector<128x128xbf16>, vector<128x128xf32> -> vector<128x128xf32>
    %15 = arith.addf %13, %14 : vector<128x128xf32>
    %16 = arith.addf %12, %15 : vector<128x128xf32>
    %c0_9 = arith.constant 0 : index
    %c0_10 = arith.constant 0 : index
    %17 = vector.load %arg7[%c0_9, %c0_10] : memref<128x128xf32, #tpu.memory_space<vmem>>, vector<128x128xf32>
    tpu.vector_store %arg7[%c0_9, %c0_10], %16 {strides = array<i32>} : memref<128x128xf32, #tpu.memory_space<vmem>>, vector<128x128xf32>,
    %c1_i32 = arith.constant 1 : i32
    %18 = arith.cmpi eq, %arg1, %c1_i32 : i32
    %19 = arith.extui %18 : i1 to i32
    %c0_i32_11 = arith.constant 0 : i32
    %20 = arith.cmpi ne, %19, %c0_i32_11 : i32
    scf.if %20 {
      %c0_12 = arith.constant 0 : index
      %c0_13 = arith.constant 0 : index
      %21 = vector.load %arg7[%c0_12, %c0_13] : memref<128x128xf32, #tpu.memory_space<vmem>>, vector<128x128xf32>
      %c0_14 = arith.constant 0 : index
      %c0_15 = arith.constant 0 : index
      %22 = vector.load %arg5[%c0_14, %c0_15] : memref<128x1xf32, #tpu.memory_space<vmem>>, vector<128x1xf32>
      %23 = vector.broadcast %22 : vector<128x1xf32> to vector<128x128xf32>
      %24 = arith.mulf %21, %23 : vector<128x128xf32>
      %c0_16 = arith.constant 0 : index
      %c0_17 = arith.constant 0 : index
      %25 = vector.load %arg7[%c0_16, %c0_17] : memref<128x128xf32, #tpu.memory_space<vmem>>, vector<128x128xf32>
      tpu.vector_store %arg7[%c0_16, %c0_17], %24 {strides = array<i32>} : memref<128x128xf32, #tpu.memory_space<vmem>>, vector<128x128xf32>,
      %c0_18 = arith.constant 0 : index
      %c0_19 = arith.constant 0 : index
      %26 = vector.load %arg6[%c0_18, %c0_19] : memref<128x128xf32, #tpu.memory_space<vmem>>, vector<128x128xf32>
      %27 = arith.addf %26, %24 : vector<128x128xf32>
      %cst_20 = arith.constant 1.000000e+00 : f32
      %28 = vector.broadcast %cst_20 : f32 to vector<128x128xf32>
      %29 = arith.mulf %27, %28 : vector<128x128xf32>
      %c0_21 = arith.constant 0 : index
      %c0_22 = arith.constant 0 : index
      %30 = vector.load %arg8[%c0_21, %c0_22] : memref<128x128xf32, #tpu.memory_space<vmem>>, vector<128x128xf32>
      tpu.vector_store %arg8[%c0_21, %c0_22], %29 {strides = array<i32>} : memref<128x128xf32, #tpu.memory_space<vmem>>, vector<128x128xf32>,
    } else {
    }
    return
  }
  func.func @transform_0(%arg0: i32, %arg1: i32) -> (i32, i32) {
    %c0_i32 = arith.constant 0 : i32
    return %arg0, %arg1 : i32, i32
  }
  func.func @transform_1(%arg0: i32, %arg1: i32) -> (i32, i32) {
    %c0_i32 = arith.constant 0 : i32
    %c0_i32_0 = arith.constant 0 : i32
    return %arg1, %c0_i32 : i32, i32
  }
  func.func @transform_2(%arg0: i32, %arg1: i32) -> (i32, i32) {
    %c0_i32 = arith.constant 0 : i32
    %c0_i32_0 = arith.constant 0 : i32
    return %arg1, %c0_i32 : i32, i32
  }
  func.func @transform_3(%arg0: i32, %arg1: i32) -> (i32, i32) {
    %c0_i32 = arith.constant 0 : i32
    %c0_i32_0 = arith.constant 0 : i32
    return %arg0, %c0_i32 : i32, i32
  }
  func.func @transform_4(%arg0: i32, %arg1: i32) -> (i32, i32) {
    %c0_i32 = arith.constant 0 : i32
    %c0_i32_0 = arith.constant 0 : i32
    return %arg0, %c0_i32 : i32, i32
  }
  func.func @transform_5(%arg0: i32, %arg1: i32) -> (i32, i32) {
    %c0_i32 = arith.constant 0 : i32
    %c0_i32_0 = arith.constant 0 : i32
    return %arg0, %c0_i32 : i32, i32
  }
  func.func @transform_6(%arg0: i32, %arg1: i32) -> (i32, i32) {
    %c0_i32 = arith.constant 0 : i32
    %c0_i32_0 = arith.constant 0 : i32
    return %arg0, %c0_i32 : i32, i32
  }
}

</mosaic_0001>

<bundles_post_ra>
// kernel: tpu_custom_call.1
= control target key start
LH: loop header
LB: loop body
LE: loop exit
PB: predicated region body
PF: predicated region fallthrough
CT: control target
= control target key end

     0   :  { %s2371_s0 = inlined_call_operand.vmem [shape: bf16[256,256], index: 0, kind: input, shape index: {}]   ;;  %s2372_s1 = inlined_call_operand.vmem [shape: f32[256,128], index: 1, kind: input, shape index: {}]   ;;  %s2373_s2 = inlined_call_operand.vmem [shape: f32[256,1], index: 2, kind: input, shape index: {}]   ;;  %s2374_s3 = inlined_call_operand.vmem [shape: f32[256,1], index: 3, kind: input, shape index: {}]   ;;  %s2375_s4 = inlined_call_operand.hbm [shape: f32[256,128], index: 4, kind: input, shape index: {}]   ;;  %s2376_s5 = inlined_call_operand.hbm [shape: f32[256,128], index: 5, kind: output, shape index: {0}]   ;;  %s2377_s6 = inlined_call_operand.hbm [shape: f32[256,128], index: 6, kind: output, shape index: {1}]  }
   0x1   :  { %2385 = sst [smem:[#allocation20_spill]] %s2371_s0 }
   0x2   :  { %2386 = sst [smem:[#allocation21_spill]] %s2375_s4 }
   0x3   :  { %12 = vsyncpa [#allocation4], 0 }
   0x4   :  { %14 = vsyncpa [#allocation4 + $0x1], 0 }
   0x5   :  { %15 = vsyncpa [#allocation5], 0 }
   0x6   :  { %17 = vsyncpa [#allocation5 + $0x1], 0 }
   0x7   :  { %18 = vsyncpa [#allocation8], 0 }
   0x8   :  { %20 = vsyncpa [#allocation8 + $0x1], 0  ;;  %s1885_s21 = smov 0   ;;  %s1887_s22 = smov 0  }
   0x9   :  { %s1889_s23 = smov 0   ;;  %s1891_s24 = smov 0  }
   0xa   :  { %s1893_s25 = smov 0   ;;  %s1895_s26 = smov 0  }
   0xb   :  { %s1897_s27 = smov 0   ;;  %s1899_s28 = smov 0  }
   0xc   :  { %s1901_s29 = smov 0   ;;  %s1903_s30 = smov 0  }
   0xd LB: > { %2387 = sst [smem:[#allocation12_spill]] %s1810_s23  ;;  %s1395_s7 = sadd.s32 4294967295, %s1838_s30   ;;  %s1838_s30 = sphi %s1903_s30, %s26_s30   ;;  %s1834_s29 = sphi %s1901_s29, %s2411_s29   ;;  %s1830_s28 = sphi %s1899_s28, %s2410_s28   ;;  %s1826_s27 = sphi %s1897_s27, %s2409_s27   ;;  %s1822_s26 = sphi %s1895_s26, %s2408_s26   ;;  %s1818_s25 = sphi %s1893_s25, %s2407_s25   ;;  %s1814_s24 = sphi %s1891_s24, %s2406_s24   ;;  %s1810_s23 = sphi %s1889_s23, %s2405_s23   ;;  %s1806_s22 = sphi %s1887_s22, %s2413_s22   ;;  %s1802_s21 = sphi %s1885_s21, %s2412_s21  }
   0xe   : > { %2388 = sst [smem:[#allocation13_spill]] %s1818_s25  ;;  %s1396_s8 = sadd.s32 4294967294, %s1838_s30  }
   0xf   : > { %2389 = sst [smem:[#allocation14_spill]] %s1830_s28  ;;  %s35_s9 = sadd.s32 1, %s1830_s28 }
  0x10   : > { %2390 = sst [smem:[#allocation15_spill]] %s1834_s29  ;;  %s38_s10 = sadd.s32 1, %s1834_s29 }
  0x11   : > { %p36_p0 = scmp.ge.s32.totalorder %s35_s9, 2  ;;  %s47_s11 = sadd.s32 1, %s1818_s25 }
  0x12   : > { %p54_p1 = scmp.ne.s32.totalorder %s1818_s25, %s1814_s24  ;;  %p55_p2 = scmp.eq.s32.totalorder %s1838_s30, 0 }
  0x13   : > { %s2415_s9 = smov (%p36_p0, %s35_s9), 0  ;;  %s2417_s10 = smov (!%p36_p0, %s38_s10), %s1834_s29 }
  0x14   : > { %2391 = sst [smem:[#allocation16_spill]] %s2415_s9  ;;  %s43_s12 = ssub.s32 %s1830_s28, %s2415_s9 }
  0x15   : > { %p1948_p3 = por %p55_p2, %p54_p1  ;;  %p40_p4 = scmp.ge.s32.totalorder %s2417_s10, 2 }
  0x16   : > { %s151_s14 = sadd.s32 1, %s1810_s23  ;;  %p158_p5 = scmp.ne.s32.totalorder %s1810_s23, %s1806_s22 }
  0x17   : > { %p164_p6 = scmp.ne.s32.totalorder %s1806_s22, %s1802_s21  ;;  %s2419_s10 = smov (%p40_p4, %s2417_s10), 0 }
  0x18   : > { %2393 = sst [smem:[#allocation17_spill]] %s2419_s10  ;;  %p1962_p7 = por %p158_p5, %p55_p2 }
  0x19   : > { %p165_p8 = scmp.eq.s32.totalorder %s1395_s7, 0  ;;  %s42_s16 = ssub.s32 %s1834_s29, %s2419_s10 }
  0x1a   : > { %p188_p9 = scmp.eq.s32.totalorder %s1395_s7, 3  ;;  %s44_s17 = sor.u32 %s43_s12, %s42_s16 }
  0x1b   : > { %p149_p10 = scmp.eq.s32.totalorder %s42_s16, 0  ;;  %p45_p11 = scmp.eq.s32.totalorder %s44_s17, 0 }
  0x1c   : > { %p1971_p12 = por %p165_p8, %p164_p6  ;;  %p1984_p13 = por %p188_p9, %p158_p5 }
  0x1d   : > { %s1976_s19 = scalar_select %p149_p10, %s1810_s23, %s151_s14  }
  0x1e   : > { %s1979_s20 = scalar_select %p45_p11, %s1818_s25, %s47_s11  }
  0x1f   : > { %2396 = sst [smem:[#allocation18_spill]] %s1976_s19  ;;  %p194_p0 = scmp.eq.s32.totalorder %s1396_s8, 3 }
  0x20   : > { %2397 = sst [smem:[#allocation19_spill]] %s1979_s20  ;;  %p1398_p2 = scmp.ge.s32.totalorder %s1838_s30, 4 }
  0x21   : > { %s2398_s9 = scalar_select %p1984_p13, 1, 0 }
  0x22   : > { %p1991_p1 = por %p194_p0, %p164_p6  ;;  %236 = sbr.rel (%p1398_p2) target bundleno = 91 (0x5b), region = 16 }
  0x24   : > { %s2399_s7 = scalar_select %p1991_p1, 1, 0 }
  0x29   : > { %239 = sbr.rel (!%p1948_p3) target bundleno = 61 (0x3d), region = 20  ;;  %s241_s11 = sand.u32 (%p1948_p3), 1, %s1818_s25  }
  0x2a   : > { %s1435_s12 = sshll.u32 (%p1948_p3), %s1834_s29, 5  ;;  %s1399_s14 = sshll.u32 (%p1948_p3), %s241_s11, 6 }
  0x2b   : > { %s246_s16 = sadd.s32 (%p1948_p3), %s1830_s28, %s1435_s12  ;;  %s2400_s0 = sld [smem:[#allocation20_spill]] (%p1948_p3) }
  0x2c   : > { %s1402_s17 = sshll.u32 (%p1948_p3), %s246_s16, 2  ;;  %s243_s13 = scalar_lea.vmem (%p1948_p3), [#allocation2], %s1399_s14 }
  0x31   : > { %s2004_s20 = scalar_lea.vmem %s2400_s0, %s1402_s17 }
  0x32   : > { %v264_v0 = vld [vmem:[%s2004_s20] sm:$0xf]  ;;  %v266_v1 = vld [vmem:[%s2004_s20 + $0x8] sm:$0xf]  ;;  %v268_v2 = vld [vmem:[%s2004_s20 + $0x10] sm:$0xf] }
  0x33   : > { %265 = vst [vmem:[%s243_s13] sm:$0xf] %v264_v0  ;;  %267 = vst [vmem:[%s243_s13 + $0x4] sm:$0xf] %v266_v1  ;;  %v270_v3 = vld [vmem:[%s2004_s20 + $0x18] sm:$0xf] }
  0x34   : > { %269 = vst [vmem:[%s243_s13 + $0x8] sm:$0xf] %v268_v2  ;;  %v272_v4 = vld [vmem:[%s2004_s20 + $0x20] sm:$0xf]  ;;  %v274_v5 = vld [vmem:[%s2004_s20 + $0x28] sm:$0xf] }
  0x35   : > { %271 = vst [vmem:[%s243_s13 + $0xc] sm:$0xf] %v270_v3  ;;  %273 = vst [vmem:[%s243_s13 + $0x10] sm:$0xf] %v272_v4  ;;  %v276_v6 = vld [vmem:[%s2004_s20 + $0x30] sm:$0xf] }
  0x36   : > { %275 = vst [vmem:[%s243_s13 + $0x14] sm:$0xf] %v274_v5  ;;  %v278_v7 = vld [vmem:[%s2004_s20 + $0x38] sm:$0xf]  ;;  %v280_v8 = vld [vmem:[%s2004_s20 + $0x40] sm:$0xf] }
  0x37   : > { %277 = vst [vmem:[%s243_s13 + $0x18] sm:$0xf] %v276_v6  ;;  %279 = vst [vmem:[%s243_s13 + $0x1c] sm:$0xf] %v278_v7  ;;  %v282_v9 = vld [vmem:[%s2004_s20 + $0x48] sm:$0xf] }
  0x38   : > { %281 = vst [vmem:[%s243_s13 + $0x20] sm:$0xf] %v280_v8  ;;  %v284_v10 = vld [vmem:[%s2004_s20 + $0x50] sm:$0xf]  ;;  %v286_v11 = vld [vmem:[%s2004_s20 + $0x58] sm:$0xf] }
  0x39   : > { %283 = vst [vmem:[%s243_s13 + $0x24] sm:$0xf] %v282_v9  ;;  %285 = vst [vmem:[%s243_s13 + $0x28] sm:$0xf] %v284_v10  ;;  %v288_v12 = vld [vmem:[%s2004_s20 + $0x60] sm:$0xf] }
  0x3a   : > { %287 = vst [vmem:[%s243_s13 + $0x2c] sm:$0xf] %v286_v11  ;;  %v290_v13 = vld [vmem:[%s2004_s20 + $0x68] sm:$0xf]  ;;  %v292_v14 = vld [vmem:[%s2004_s20 + $0x70] sm:$0xf] }
  0x3b   : > { %289 = vst [vmem:[%s243_s13 + $0x30] sm:$0xf] %v288_v12  ;;  %291 = vst [vmem:[%s243_s13 + $0x34] sm:$0xf] %v290_v13  ;;  %v294_v15 = vld [vmem:[%s2004_s20 + $0x78] sm:$0xf] }
  0x3c   : > { %293 = vst [vmem:[%s243_s13 + $0x38] sm:$0xf] %v292_v14  ;;  %295 = vst [vmem:[%s243_s13 + $0x3c] sm:$0xf] %v294_v15 }
  0x3d PF: > { %s378_s10 = sand.u32 1, %s1810_s23   ;;  %s1436_s11 = sshll.u32 %s1834_s29, 11 }
  0x3e   : > { %s1403_s12 = sshll.u32 %s378_s10, 7  ;;  %s2401_s4 = sld [smem:[#allocation21_spill]] }
  0x3f   : > { %s382_s8 = scalar_lea.vmem [#allocation3], %s1403_s12  ;;  %s2031_s20 = scalar_lea.sflag [#allocation4], %s378_s10 }
  0x40   : > { %s389_s0 = sshll.u32 %s382_s8, 4  ;;  %s2029_s0 = int_to_ptr.vmem [resolvable:$true] %s389_s0 }
  0x44   : > { %s2027_s17 = scalar_lea.hbm %s2401_s4, %s1436_s11  ;;  %s1668_s11 = scalar_lea.hbm %s2401_s4, 4096 }
  0x45   : > { %s1664_s13 = scalar_lea.hbm %s2027_s17, 2048  ;;  %p1669_p6 = scmp.lt.u32.totalorder %s2027_s17, %s2401_s4 }
  0x46   : > { %p1665_p3 = scmp.ne.s32.totalorder %s2027_s17, %s1664_s13  ;;  %p1670_p8 = scmp.lt.u32.totalorder %s1668_s11, %s1664_s13 }
  0x47   : > { %p1672_p10 = scmp.lt.u32.totalorder %s1664_s13, %s2027_s17 }
  0x48   : > { %p1666_p4 = pnand %p1665_p3, %p1962_p7  ;;  %p1671_p9 = por %p1670_p8, %p1669_p6 }
  0x4a   : > { %p1667_p5 = pneg %p1666_p4  ;;  %p1673_p11 = por %p1672_p10, %p1671_p9 }
  0x4c   : > { %p1674_p0 = pnand %p1673_p11, %p1667_p5 }
  0x4e   : > { %1677 = shalt.err (!%p1674_p0)
}
  0x4f   : > { %s1678_s10 = scalar_lea.vmem %s2029_s0, 2048  ;;  %s1840_s28 = smov [#allocation3]  }
  0x50   : > { %p1679_p2 = scmp.ne.s32.totalorder %s2029_s0, %s1678_s10  ;;  %s1682_s29 = sshll.u32 %s1840_s28, 4  ;;  %s1683_s29 = int_to_ptr.vmem [resolvable:$false] %s1682_s29 }
  0x51   : > { %s1684_s12 = scalar_lea.vmem %s1683_s29, 4096  ;;  %p1685_p1 = scmp.lt.s32.totalorder %s2029_s0, %s1683_s29 }
  0x52   : > { %p1680_p3 = pnand %p1679_p2, %p1962_p7  ;;  %p1686_p13 = scmp.lt.s32.totalorder %s1684_s12, %s1678_s10 }
  0x54   : > { %p1681_p4 = pneg %p1680_p3  ;;  %p1687_p6 = por %p1686_p13, %p1685_p1 }
  0x56   : > { %p1688_p8 = pnand %p1687_p6, %p1681_p4 }
  0x58   : > { %1691 = shalt.err (!%p1688_p8)
}
  0x59   : > { %s1841_s8 = smov 128   ;;  %s1842_s13 = smov 8  }
  0x5a   : > { %1551 = dma.hbm_to_vmem [thread:$0]  (%p1962_p7), %s2027_s17, 2048, %s2029_s0, %s2031_s20, %s1841_s8, %s1841_s8, %s1842_s13  }
  0x5b PF: > { %p1406_p5 = scmp.ge.s32.totalorder %s1838_s30, 1  ;;  %p397_p9 = scmp.lt.s32.totalorder %s1838_s30, 5 }
  0x5d   : > { %p398_p10 = pnand %p1406_p5, %p397_p9 }
  0x5e   : > { %s404_s11 = sand.u32 (!%p398_p10), 1, %s1814_s24   ;;  %s2059_s14 = sand.u32 (!%p398_p10), 1, %s1806_s22  }
  0x5f   : > { %401 = sbr.rel (%p398_p10) target bundleno = 731 (0x2db), region = 77  ;;  %s1407_s16 = sshll.u32 (!%p398_p10), %s404_s11, 6 }
  0x60   : > { %s1408_s10 = sshll.u32 (!%p398_p10), %s2059_s14, 7  ;;  %s2062_s28 = scalar_lea.vmem (!%p398_p10), [#allocation2], %s1407_s16 }
  0x61   : > { %s411_s0 = scalar_lea.sflag (!%p398_p10), [#allocation4], %s2059_s14  ;;  %s2065_s15 = scalar_lea.vmem (!%p398_p10), [#allocation3], %s1408_s10 }
  0x66   : > { %1789 = dma.done.wait (%p1971_p12), %s411_s0, 2048  }
  0x67   : > { %1791 = vsyncadd (%p1971_p12), %s411_s0, 4294965248  ;;  %s1411_s17 = sshll.u32 %s1822_s26, 4  ;;  %s1415_s24 = sshll.u32 %s1826_s27, 4 }
  0x68   : > { %p469_p7 = scmp.lt.s32.totalorder %s1411_s17, 31  ;;  %p481_p13 = scmp.lt.s32.totalorder %s1415_s24, 31 }
  0x69   : > { %s2088_s19 = scalar_lea.vmem [#allocation6], %s1408_s10  ;;  %s2090_s23 = scalar_lea.vmem [#allocation7], %s1408_s10 }
  0x6a   : > { %s2421_s17 = smov (!%p469_p7, %s1411_s17), 31  ;;  %s2423_s24 = smov (!%p481_p13, %s1415_s24), 31 }
  0x6b   : > { %s1412_s20 = sshll.u32 %s2421_s17, 3  ;;  %s1416_s18 = sshll.u32 %s2423_s24, 3 }
  0x6c   : > { %s2076_s8 = scalar_lea.vmem %s2372_s1, %s1412_s20  ;;  %s2081_s16 = scalar_lea.vmem %s2373_s2, %s1412_s20 }
  0x6d   : > { %s2086_s25 = scalar_lea.vmem %s2374_s3, %s1416_s18  ;;  %p1417_p12 = scmp.ne.s32.totalorder %s1822_s26, 0 }
  0x6e   : > { %v1843_v16 = vmov (!%p1417_p12), 0.0  }
  0x6f   : > { %493 = sbr.rel (%p1417_p12) target bundleno = 119 (0x77), region = 89  ;;  %494 = vst [vmem:[%s2088_s19] sm:$0xff] (!%p1417_p12), %v1843_v16  ;;  %495 = vst [vmem:[%s2088_s19 + $0x8] sm:$0xff] (!%p1417_p12), %v1843_v16 }
  0x70   : > { %496 = vst [vmem:[%s2088_s19 + $0x10] sm:$0xff] (!%p1417_p12), %v1843_v16  ;;  %497 = vst [vmem:[%s2088_s19 + $0x18] sm:$0xff] (!%p1417_p12), %v1843_v16 }
  0x71   : > { %498 = vst [vmem:[%s2088_s19 + $0x20] sm:$0xff] (!%p1417_p12), %v1843_v16  ;;  %499 = vst [vmem:[%s2088_s19 + $0x28] sm:$0xff] (!%p1417_p12), %v1843_v16 }
  0x72   : > { %500 = vst [vmem:[%s2088_s19 + $0x30] sm:$0xff] (!%p1417_p12), %v1843_v16  ;;  %501 = vst [vmem:[%s2088_s19 + $0x38] sm:$0xff] (!%p1417_p12), %v1843_v16 }
  0x73   : > { %502 = vst [vmem:[%s2088_s19 + $0x40] sm:$0xff] (!%p1417_p12), %v1843_v16  ;;  %503 = vst [vmem:[%s2088_s19 + $0x48] sm:$0xff] (!%p1417_p12), %v1843_v16 }
  0x74   : > { %504 = vst [vmem:[%s2088_s19 + $0x50] sm:$0xff] (!%p1417_p12), %v1843_v16  ;;  %505 = vst [vmem:[%s2088_s19 + $0x58] sm:$0xff] (!%p1417_p12), %v1843_v16 }
  0x75   : > { %506 = vst [vmem:[%s2088_s19 + $0x60] sm:$0xff] (!%p1417_p12), %v1843_v16  ;;  %507 = vst [vmem:[%s2088_s19 + $0x68] sm:$0xff] (!%p1417_p12), %v1843_v16 }
  0x76   : > { %508 = vst [vmem:[%s2088_s19 + $0x70] sm:$0xff] %v1843_v16  ;;  %509 = vst [vmem:[%s2088_s19 + $0x78] sm:$0xff] %v1843_v16 }
  0x77 PF: > { %v528_v17 = vld [vmem:[%s2081_s16 + $0x10] sm:$0xff]  ;;  %v526_v18 = vld [vmem:[%s2081_s16] sm:$0xff]  ;;  %v1844_v19 = vmov 0   ;;  %v529_v20 = vld [vmem:[%s2081_s16 + $0x18] sm:$0xff]  ;;  %p1426_p1 = scmp.ne.s32.totalorder %s1822_s26, 1 }
  0x78   : > { %1653 = vset.pattern.permute.xlu1 %v1844_v19  ;;  %1652 = vset.pattern.permute.xlu0 %v1844_v19  ;;  %v527_v21 = vld [vmem:[%s2081_s16 + $0x8] sm:$0xff]  ;;  %v530_v23 = vld [vmem:[%s2081_s16 + $0x20] sm:$0xff]  ;;  %v533_v24 = vld [vmem:[%s2081_s16 + $0x38] sm:$0xff] }
  0x79   : > { %554 = vperm.xlu1 %1653, %v528_v17   ;;  %544 = vperm.xlu0 %1652, %v526_v18   ;;  %v531_v22 = vld [vmem:[%s2081_s16 + $0x28] sm:$0xff]  ;;  %v532_v25 = vld [vmem:[%s2081_s16 + $0x30] sm:$0xff]  ;;  %v534_v27 = vld [vmem:[%s2081_s16 + $0x40] sm:$0xff] }
  0x7a   : > { %v535_v26 = vld [vmem:[%s2081_s16 + $0x48] sm:$0xff]  ;;  %v537_v28 = vld [vmem:[%s2081_s16 + $0x58] sm:$0xff]  ;;  %v536_v29 = vld [vmem:[%s2081_s16 + $0x50] sm:$0xff] }
  0x7b   : > { %v539_v30 = vld [vmem:[%s2081_s16 + $0x68] sm:$0xff]  ;;  %v538_v31 = vld [vmem:[%s2081_s16 + $0x60] sm:$0xff]  ;;  %v541_v32 = vld [vmem:[%s2081_s16 + $0x78] sm:$0xff] }
  0x7c   : > { %v540_v33 = vld [vmem:[%s2081_s16 + $0x70] sm:$0xff]  ;;  %v1654_v34 = vld [vmem:[%s2062_s28] sm:$0xff]   ;;  %v513_v39 = vld [vmem:[%s2076_s8 + $0x18] sm:$0xff] }
  0x7d   : > { %559 = vperm.xlu1 %1653, %v529_v20   ;;  %549 = vperm.xlu0 %1652, %v527_v21   ;;  %v512_v36 = vld [vmem:[%s2076_s8 + $0x10] sm:$0xff]  ;;  %v510_v38 = vld [vmem:[%s2076_s8] sm:$0xff]  ;;  %v511_v40 = vld [vmem:[%s2076_s8 + $0x8] sm:$0xff] }
  0x7e   : > { %1519 = vmatprep.mubr.bf16.mxu0 %v1654_v34  ;;  %1487 = vmatprep.mubr.bf16.mxu1 %v1654_v34  ;;  %v515_v47 = vld [vmem:[%s2076_s8 + $0x28] sm:$0xff]  ;;  %v514_v48 = vld [vmem:[%s2076_s8 + $0x20] sm:$0xff]  ;;  %v517_v57 = vld [vmem:[%s2076_s8 + $0x38] sm:$0xff] }
  0x7f   : > { %v516_v58 = vld [vmem:[%s2076_s8 + $0x30] sm:$0xff]  ;;  %v519_v9 = vld [vmem:[%s2076_s8 + $0x48] sm:$0xff]  ;;  %v518_v10 = vld [vmem:[%s2076_s8 + $0x40] sm:$0xff] }
  0x80   : > { %v521_v20 = vld [vmem:[%s2076_s8 + $0x58] sm:$0xff]  ;;  %v520_v21 = vld [vmem:[%s2076_s8 + $0x50] sm:$0xff]  ;;  %v522_v34 = vld [vmem:[%s2076_s8 + $0x60] sm:$0xff] }
  0x81   : > { %569 = vperm.xlu1 %1653, %v531_v22   ;;  %564 = vperm.xlu0 %1652, %v530_v23  }
  0x85   : > { %579 = vperm.xlu1 %1653, %v533_v24   ;;  %574 = vperm.xlu0 %1652, %v532_v25  }
  0x89   : > { %589 = vperm.xlu1 %1653, %v535_v26   ;;  %584 = vperm.xlu0 %1652, %v534_v27  }
  0x8d   : > { %599 = vperm.xlu1 %1653, %v537_v28   ;;  %594 = vperm.xlu0 %1652, %v536_v29  }
  0x91   : > { %609 = vperm.xlu1 %1653, %v539_v30   ;;  %604 = vperm.xlu0 %1652, %v538_v31  }
  0x95   : > { %619 = vperm.xlu1 %1653, %v541_v32   ;;  %614 = vperm.xlu0 %1652, %v540_v33   ;;  %v523_v33 = vld [vmem:[%s2076_s8 + $0x68] sm:$0xff] }
  0xf8   : > { %v555_v35 = vpop.permute.xlu1 %554  ;;  %v545_v37 = vpop.permute.xlu0 %544 }
  0xf9   : > { %v624_v41 = vmul.f32 %v555_v35, %v512_v36  ;;  %v622_v44 = vmul.f32 %v545_v37, %v510_v38 }
  0xfc   : > { %v560_v42 = vpop.permute.xlu1 %559  ;;  %v550_v43 = vpop.permute.xlu0 %549 }
  0xfd   : > { %v625_v45 = vmul.f32 %v560_v42, %v513_v39  ;;  %v623_v46 = vmul.f32 %v550_v43, %v511_v40 }
  0xff   : > { %v639_v49 = vpack.c.bf16 %v625_v45, %v624_v41  ;;  %v638_v50 = vpack.c.bf16 %v623_v46, %v622_v44 }
 0x100   : > { %v570_v51 = vpop.permute.xlu1 %569  ;;  %v565_v52 = vpop.permute.xlu0 %564 }
 0x101   : > { %v649_v53 = vunpack.c.h.bf16 %v639_v49  ;;  %v647_v54 = vunpack.c.h.bf16 %v638_v50  ;;  %v627_v55 = vmul.f32 %v570_v51, %v515_v47  ;;  %v626_v56 = vmul.f32 %v565_v52, %v514_v48  ;;  %1503 = vmatprep.subr.bf16.mxu0 %v638_v50 }
 0x102   : > { %1504 = vmatpush3.bf16.msra.mxu0 %v638_v50  ;;  %v646_v59 = vunpack.c.l.bf16 %v638_v50  ;;  %v648_v60 = vunpack.c.l.bf16 %v639_v49 }
 0x103   : > { %v663_v61 = vsub.f32 %v623_v46, %v647_v54  ;;  %v640_v62 = vpack.c.bf16 %v627_v55, %v626_v56  ;;  %1505 = vmatprep.subr.bf16.mxu0 %v639_v49  ;;  %v665_v63 = vsub.f32 %v625_v45, %v649_v53  ;;  %v524_v45 = vld [vmem:[%s2076_s8 + $0x70] sm:$0xff] }
 0x104   : > { %v580_v0 = vpop.permute.xlu1 %579  ;;  %v575_v1 = vpop.permute.xlu0 %574  ;;  %v662_v2 = vsub.f32 %v622_v44, %v646_v59  ;;  %v664_v3 = vsub.f32 %v624_v41, %v648_v60  ;;  %v525_v44 = vld [vmem:[%s2076_s8 + $0x78] sm:$0xff] }
 0x105   : > { %v650_v4 = vunpack.c.l.bf16 %v640_v62  ;;  %v629_v5 = vmul.f32 %v580_v0, %v517_v57  ;;  %v628_v6 = vmul.f32 %v575_v1, %v516_v58  ;;  %v651_v7 = vunpack.c.h.bf16 %v640_v62 }
 0x106   : > { %1506 = vmatpush3.bf16.msra.mxu0 %v639_v49  ;;  %v678_v8 = vpack.c.bf16 %v663_v61, %v662_v2  ;;  %v679_v15 = vpack.c.bf16 %v665_v63, %v664_v3  ;;  %v1655_v2 = vld [vmem:[%s2062_s28 + $0x8] sm:$0xff]   ;;  %v1656_v3 = vld [vmem:[%s2062_s28 + $0x10] sm:$0xff]  }
 0x107   : > { %v641_v11 = vpack.c.bf16 %v629_v5, %v628_v6  ;;  %1507 = vmatprep.subr.bf16.mxu0 %v640_v62  ;;  %v666_v12 = vsub.f32 %v626_v56, %v650_v4  ;;  %v667_v16 = vsub.f32 %v627_v55, %v651_v7  ;;  %v1659_v7 = vld [vmem:[%s2062_s28 + $0x28] sm:$0xff]  }
 0x108   : > { %1471 = vmatprep.subr.bf16.mxu1 %v678_v8  ;;  %v590_v13 = vpop.permute.xlu1 %589  ;;  %v585_v14 = vpop.permute.xlu0 %584 }
 0x109   : > { %v652_v17 = vunpack.c.l.bf16 %v641_v11  ;;  %v631_v18 = vmul.f32 %v590_v13, %v519_v9  ;;  %v630_v19 = vmul.f32 %v585_v14, %v518_v10  ;;  %1472 = vmatpush3.bf16.msra.mxu1 %v678_v8  ;;  %v653_v22 = vunpack.c.h.bf16 %v641_v11  ;;  %v1660_v8 = vld [vmem:[%s2062_s28 + $0x30] sm:$0xff]   ;;  %v1661_v9 = vld [vmem:[%s2062_s28 + $0x38] sm:$0xff]  }
 0x10a   : > { %1473 = vmatprep.subr.bf16.mxu1 %v679_v15  ;;  %1508 = vmatpush3.bf16.msra.mxu0 %v640_v62  ;;  %v680_v27 = vpack.c.bf16 %v667_v16, %v666_v12  ;;  %v704_v14 = vld [vmem:[%s2088_s19 + $0x10] sm:$0xff] }
 0x10b   : > { %v642_v23 = vpack.c.bf16 %v631_v18, %v630_v19  ;;  %1509 = vmatprep.subr.bf16.mxu0 %v641_v11  ;;  %v668_v24 = vsub.f32 %v628_v6, %v652_v17  ;;  %v669_v28 = vsub.f32 %v629_v5, %v653_v22  ;;  %v1657_v5 = vld [vmem:[%s2062_s28 + $0x18] sm:$0xff]   ;;  %v1658_v6 = vld [vmem:[%s2062_s28 + $0x20] sm:$0xff]  }
 0x10c   : > { %v600_v25 = vpop.permute.xlu1 %599  ;;  %v595_v26 = vpop.permute.xlu0 %594  ;;  %v702_v17 = vld [vmem:[%s2088_s19] sm:$0xff] }
 0x10d   : > { %v654_v29 = vunpack.c.l.bf16 %v642_v23  ;;  %v633_v30 = vmul.f32 %v600_v25, %v521_v20  ;;  %v632_v31 = vmul.f32 %v595_v26, %v520_v21  ;;  %1474 = vmatpush3.bf16.msra.mxu1 %v679_v15  ;;  %v655_v32 = vunpack.c.h.bf16 %v642_v23  ;;  %v705_v21 = vld [vmem:[%s2088_s19 + $0x18] sm:$0xff]  ;;  %v703_v26 = vld [vmem:[%s2088_s19 + $0x8] sm:$0xff] }
 0x10e   : > { %1475 = vmatprep.subr.bf16.mxu1 %v680_v27  ;;  %1510 = vmatpush3.bf16.msra.mxu0 %v641_v11  ;;  %v681_v39 = vpack.c.bf16 %v669_v28, %v668_v24 }
 0x10f   : > { %v643_v35 = vpack.c.bf16 %v633_v30, %v632_v31  ;;  %1511 = vmatprep.subr.bf16.mxu0 %v642_v23  ;;  %v670_v36 = vsub.f32 %v630_v19, %v654_v29  ;;  %v671_v40 = vsub.f32 %v631_v18, %v655_v32 }
 0x110   : > { %v610_v37 = vpop.permute.xlu1 %609  ;;  %v605_v38 = vpop.permute.xlu0 %604 }
 0x111   : > { %v656_v41 = vunpack.c.l.bf16 %v643_v35  ;;  %v635_v42 = vmul.f32 %v610_v37, %v523_v33  ;;  %v634_v43 = vmul.f32 %v605_v38, %v522_v34  ;;  %1476 = vmatpush3.bf16.msra.mxu1 %v680_v27  ;;  %v657_v46 = vunpack.c.h.bf16 %v643_v35  ;;  %v708_v34 = vld [vmem:[%s2088_s19 + $0x30] sm:$0xff]  ;;  %v706_v37 = vld [vmem:[%s2088_s19 + $0x20] sm:$0xff] }
 0x112   : > { %1477 = vmatprep.subr.bf16.mxu1 %v681_v39  ;;  %1512 = vmatpush3.bf16.msra.mxu0 %v642_v23  ;;  %v682_v51 = vpack.c.bf16 %v671_v40, %v670_v36 }
 0x113   : > { %v644_v47 = vpack.c.bf16 %v635_v42, %v634_v43  ;;  %1513 = vmatprep.subr.bf16.mxu0 %v643_v35  ;;  %v672_v48 = vsub.f32 %v632_v31, %v656_v41  ;;  %v673_v52 = vsub.f32 %v633_v30, %v657_v46  ;;  %v709_v41 = vld [vmem:[%s2088_s19 + $0x38] sm:$0xff]  ;;  %v707_v46 = vld [vmem:[%s2088_s19 + $0x28] sm:$0xff] }
 0x114   : > { %v620_v49 = vpop.permute.xlu1 %619  ;;  %v615_v50 = vpop.permute.xlu0 %614 }
 0x115   : > { %v658_v53 = vunpack.c.l.bf16 %v644_v47  ;;  %v637_v54 = vmul.f32 %v620_v49, %v525_v44  ;;  %v636_v55 = vmul.f32 %v615_v50, %v524_v45  ;;  %1478 = vmatpush3.bf16.msra.mxu1 %v681_v39  ;;  %v659_v56 = vunpack.c.h.bf16 %v644_v47 }
 0x116   : > { %1479 = vmatprep.subr.bf16.mxu1 %v682_v51  ;;  %1514 = vmatpush3.bf16.msra.mxu0 %v643_v35  ;;  %v683_v59 = vpack.c.bf16 %v673_v52, %v672_v48 }
 0x117   : > { %v645_v57 = vpack.c.bf16 %v637_v54, %v636_v55  ;;  %1515 = vmatprep.subr.bf16.mxu0 %v644_v47  ;;  %v674_v58 = vsub.f32 %v634_v43, %v658_v53  ;;  %v675_v60 = vsub.f32 %v635_v42, %v659_v56 }
 0x119   : > { %v660_v61 = vunpack.c.l.bf16 %v645_v57  ;;  %1480 = vmatpush3.bf16.msra.mxu1 %v682_v51  ;;  %v661_v62 = vunpack.c.h.bf16 %v645_v57  ;;  %v684_v0 = vpack.c.bf16 %v675_v60, %v674_v58 }
 0x11a   : > { %1481 = vmatprep.subr.bf16.mxu1 %v683_v59  ;;  %1516 = vmatpush3.bf16.msra.mxu0 %v644_v47 }
 0x11b   : > { %1517 = vmatprep.subr.bf16.mxu0 %v645_v57  ;;  %v676_v63 = vsub.f32 %v636_v55, %v660_v61  ;;  %v677_v1 = vsub.f32 %v637_v54, %v661_v62  ;;  %v712_v54 = vld [vmem:[%s2088_s19 + $0x50] sm:$0xff]  ;;  %v713_v61 = vld [vmem:[%s2088_s19 + $0x58] sm:$0xff] }
 0x11d   : > { %1482 = vmatpush3.bf16.msra.mxu1 %v683_v59  ;;  %v685_v4 = vpack.c.bf16 %v677_v1, %v676_v63 }
 0x11e   : > { %1483 = vmatprep.subr.bf16.mxu1 %v684_v0  ;;  %1518 = vmatpush3.bf16.msra.mxu0 %v645_v57  ;;  %v710_v57 = vld [vmem:[%s2088_s19 + $0x40] sm:$0xff] }
 0x121   : > { %1484 = vmatpush3.bf16.msra.mxu1 %v684_v0  ;;  %1520 = vmatmul.mubr.bf16.vlgmr.msra.gmra.mrb[0].mxu0 %v1655_v2 }
 0x122   : > { %1485 = vmatprep.subr.bf16.mxu1 %v685_v4  ;;  %1523 = vmatprep.mubr.bf16.mxu0 %v1656_v3 }
 0x125   : > { %1486 = vmatpush3.bf16.msra.mxu1 %v685_v4 }
 0x128   : > { %1488 = vmatmul.mubr.bf16.vlgmr.msra.gmra.mrb[0].mxu1 %v1655_v2  ;;  %v711_v2 = vld [vmem:[%s2088_s19 + $0x48] sm:$0xff] }
 0x129   : > { %1524 = vmatmul.mubr.bf16.gmra.mrb[4].mxu0 %v1657_v5  ;;  %1491 = vmatprep.mubr.bf16.mxu1 %v1656_v3 }
 0x12a   : > { %1527 = vmatprep.mubr.bf16.mxu0 %v1658_v6 }
 0x130   : > { %1492 = vmatmul.mubr.bf16.gmra.mrb[4].mxu1 %v1657_v5 }
 0x131   : > { %1528 = vmatmul.mubr.bf16.gmra.mrb[8].mxu0 %v1659_v7  ;;  %1495 = vmatprep.mubr.bf16.mxu1 %v1658_v6 }
 0x132   : > { %1531 = vmatprep.mubr.bf16.mxu0 %v1660_v8 }
 0x138   : > { %1496 = vmatmul.mubr.bf16.gmra.mrb[8].mxu1 %v1659_v7 }
 0x139   : > { %1532 = vmatmul.mubr.bf16.gmra.mrb[12].mxu0 %v1661_v9  ;;  %1499 = vmatprep.mubr.bf16.mxu1 %v1660_v8 }
 0x140   : > { %1500 = vmatmul.mubr.bf16.gmra.mrb[12].mxu1 %v1661_v9 }
 0x1f4   : > { %v1521_v10 = vpop.f32.mrb[0].mxu0 }
 0x1f5   : > { %v897_v11 = vpop.f32.mrb[1].mxu0 }
 0x1f6   : > { %v1522_v12 = vpop.f32.mrb[2].mxu0 }
 0x1f7   : > { %v900_v13 = vpop.f32.mrb[3].mxu0 }
 0x1fb   : > { %v1489_v15 = vpop.f32.mrb[0].mxu1 }
 0x1fc   : > { %v906_v16 = vadd.f32 %v1521_v10, %v1489_v15  ;;  %v800_v18 = vpop.f32.mrb[1].mxu1  ;;  %v1525_v19 = vpop.f32.mrb[4].mxu0  ;;  %v716_v10 = vld [vmem:[%s2088_s19 + $0x70] sm:$0xff] }
 0x1fd   : > { %v898_v20 = vadd.f32 %v897_v11, %v800_v18  ;;  %v1490_v22 = vpop.f32.mrb[2].mxu1  ;;  %v913_v23 = vpop.f32.mrb[5].mxu0 }
 0x1fe   : > { %v962_v24 = vadd.f32 %v906_v16, %v704_v14  ;;  %v909_v25 = vadd.f32 %v1522_v12, %v1490_v22  ;;  %v803_v27 = vpop.f32.mrb[3].mxu1  ;;  %v1526_v28 = vpop.f32.mrb[6].mxu0  ;;  %v717_v16 = vld [vmem:[%s2088_s19 + $0x78] sm:$0xff] }
 0x1ff   : > { %v960_v29 = vadd.f32 %v898_v20, %v702_v17  ;;  %v901_v30 = vadd.f32 %v900_v13, %v803_v27  ;;  %v916_v31 = vpop.f32.mrb[7].mxu0  ;;  %v714_v13 = vld [vmem:[%s2088_s19 + $0x60] sm:$0xff]  ;;  %v715_v20 = vld [vmem:[%s2088_s19 + $0x68] sm:$0xff] }
 0x200   : > { %978 = vst [vmem:[%s2088_s19 + $0x10] sm:$0xff] %v962_v24  ;;  %v963_v32 = vadd.f32 %v909_v25, %v705_v21  ;;  %v1012_v27 = vld [vmem:[%s2086_s25] sm:$0xff] (!%p1426_p1) }
 0x201   : > { %976 = vst [vmem:[%s2088_s19] sm:$0xff] %v960_v29  ;;  %v961_v33 = vadd.f32 %v901_v30, %v703_v26  ;;  %v1014_v26 = vld [vmem:[%s2086_s25 + $0x10] sm:$0xff] (!%p1426_p1)  ;;  %v1015_v29 = vld [vmem:[%s2086_s25 + $0x18] sm:$0xff] (!%p1426_p1)  ;;  %v1013_v30 = vld [vmem:[%s2086_s25 + $0x8] sm:$0xff] (!%p1426_p1) }
 0x202   : > { %979 = vst [vmem:[%s2088_s19 + $0x18] sm:$0xff] %v963_v32  ;;  %v1016_v32 = vld [vmem:[%s2086_s25 + $0x20] sm:$0xff] (!%p1426_p1) }
 0x203   : > { %977 = vst [vmem:[%s2088_s19 + $0x8] sm:$0xff] %v961_v33  ;;  %v1493_v35 = vpop.f32.mrb[4].mxu1  ;;  %v1019_v33 = vld [vmem:[%s2086_s25 + $0x38] sm:$0xff] (!%p1426_p1) }
 0x204   : > { %v922_v36 = vadd.f32 %v1525_v19, %v1493_v35  ;;  %v816_v38 = vpop.f32.mrb[5].mxu1  ;;  %v1529_v39 = vpop.f32.mrb[8].mxu0  ;;  %v1021_v35 = vld [vmem:[%s2086_s25 + $0x48] sm:$0xff] (!%p1426_p1) }
 0x205   : > { %v914_v40 = vadd.f32 %v913_v23, %v816_v38  ;;  %v1494_v42 = vpop.f32.mrb[6].mxu1  ;;  %v929_v43 = vpop.f32.mrb[9].mxu0  ;;  %v1022_v38 = vld [vmem:[%s2086_s25 + $0x50] sm:$0xff] (!%p1426_p1) }
 0x206   : > { %v966_v44 = vadd.f32 %v922_v36, %v708_v34  ;;  %v925_v45 = vadd.f32 %v1526_v28, %v1494_v42  ;;  %v819_v47 = vpop.f32.mrb[7].mxu1  ;;  %v1530_v48 = vpop.f32.mrb[10].mxu0  ;;  %v1845_v28 = vmov (!%p1426_p1), 0   ;;  %v1018_v34 = vld [vmem:[%s2086_s25 + $0x30] sm:$0xff] (!%p1426_p1)  ;;  %v1020_v36 = vld [vmem:[%s2086_s25 + $0x40] sm:$0xff] (!%p1426_p1) }
 0x207   : > { %v964_v49 = vadd.f32 %v914_v40, %v706_v37  ;;  %v917_v50 = vadd.f32 %v916_v31, %v819_v47  ;;  %v932_v51 = vpop.f32.mrb[11].mxu0  ;;  %1663 = vset.pattern.permute.xlu1 (!%p1426_p1), %v1845_v28  ;;  %1662 = vset.pattern.permute.xlu0 (!%p1426_p1), %v1845_v28  ;;  %v1017_v31 = vld [vmem:[%s2086_s25 + $0x28] sm:$0xff] (!%p1426_p1)  ;;  %v1023_v37 = vld [vmem:[%s2086_s25 + $0x58] sm:$0xff] (!%p1426_p1)  ;;  %v1024_v40 = vld [vmem:[%s2086_s25 + $0x60] sm:$0xff] (!%p1426_p1) }
 0x208   : > { %982 = vst [vmem:[%s2088_s19 + $0x30] sm:$0xff] %v966_v44  ;;  %v967_v52 = vadd.f32 %v925_v45, %v709_v41  ;;  %1040 = vperm.xlu1 (!%p1426_p1), %1663, %v1014_v26   ;;  %1030 = vperm.xlu0 (!%p1426_p1), %1662, %v1012_v27   ;;  %v1027_v41 = vld [vmem:[%s2086_s25 + $0x78] sm:$0xff] (!%p1426_p1)  ;;  %v1026_v42 = vld [vmem:[%s2086_s25 + $0x70] sm:$0xff] (!%p1426_p1)  ;;  %v996_v44 = vld [vmem:[%s2088_s19] sm:$0xff] (!%p1426_p1) }
 0x209   : > { %980 = vst [vmem:[%s2088_s19 + $0x20] sm:$0xff] %v964_v49  ;;  %v965_v53 = vadd.f32 %v917_v50, %v707_v46  ;;  %v1142_v45 = vld [vmem:[%s2065_s15 + $0x10] sm:$0xff] (!%p1426_p1)  ;;  %v1140_v47 = vld [vmem:[%s2065_s15] sm:$0xff] (!%p1426_p1) }
 0x20a   : > { %983 = vst [vmem:[%s2088_s19 + $0x38] sm:$0xff] %v967_v52  ;;  %v997_v52 = vld [vmem:[%s2088_s19 + $0x8] sm:$0xff] (!%p1426_p1) }
 0x20b   : > { %981 = vst [vmem:[%s2088_s19 + $0x28] sm:$0xff] %v965_v53  ;;  %v1497_v55 = vpop.f32.mrb[8].mxu1 }
 0x20c   : > { %v938_v56 = vadd.f32 %v1529_v39, %v1497_v55  ;;  %v832_v58 = vpop.f32.mrb[9].mxu1  ;;  %v1533_v59 = vpop.f32.mrb[12].mxu0  ;;  %1045 = vperm.xlu1 (!%p1426_p1), %1663, %v1015_v29   ;;  %1035 = vperm.xlu0 (!%p1426_p1), %1662, %v1013_v30   ;;  %v1025_v39 = vld [vmem:[%s2086_s25 + $0x68] sm:$0xff] (!%p1426_p1)  ;;  %v1143_v55 = vld [vmem:[%s2065_s15 + $0x18] sm:$0xff] (!%p1426_p1) }
 0x20d   : > { %v930_v60 = vadd.f32 %v929_v43, %v832_v58  ;;  %v1498_v62 = vpop.f32.mrb[10].mxu1  ;;  %v945_v63 = vpop.f32.mrb[13].mxu0  ;;  %v998_v43 = vld [vmem:[%s2088_s19 + $0x10] sm:$0xff] (!%p1426_p1) }
 0x20e   : > { %v970_v0 = vadd.f32 %v938_v56, %v712_v54  ;;  %v941_v1 = vadd.f32 %v1530_v48, %v1498_v62  ;;  %v835_v3 = vpop.f32.mrb[11].mxu1  ;;  %v1534_v4 = vpop.f32.mrb[14].mxu0 }
 0x20f   : > { %v968_v5 = vadd.f32 %v930_v60, %v710_v57  ;;  %v933_v6 = vadd.f32 %v932_v51, %v835_v3  ;;  %v948_v7 = vpop.f32.mrb[15].mxu0  ;;  %v999_v51 = vld [vmem:[%s2088_s19 + $0x18] sm:$0xff] (!%p1426_p1)  ;;  %v1141_v57 = vld [vmem:[%s2065_s15 + $0x8] sm:$0xff] (!%p1426_p1)  ;;  %v1144_v3 = vld [vmem:[%s2065_s15 + $0x20] sm:$0xff] (!%p1426_p1) }
 0x210   : > { %986 = vst [vmem:[%s2088_s19 + $0x50] sm:$0xff] %v970_v0  ;;  %v971_v8 = vadd.f32 %v941_v1, %v713_v61  ;;  %1055 = vperm.xlu1 (!%p1426_p1), %1663, %v1017_v31   ;;  %1050 = vperm.xlu0 (!%p1426_p1), %1662, %v1016_v32   ;;  %v1000_v62 = vld [vmem:[%s2088_s19 + $0x20] sm:$0xff] (!%p1426_p1)  ;;  %v1145_v1 = vld [vmem:[%s2065_s15 + $0x28] sm:$0xff] (!%p1426_p1)  ;;  %v1151_v31 = vld [vmem:[%s2065_s15 + $0x58] sm:$0xff] (!%p1426_p1) }
 0x211   : > { %984 = vst [vmem:[%s2088_s19 + $0x40] sm:$0xff] %v968_v5  ;;  %v969_v9 = vadd.f32 %v933_v6, %v711_v2 }
 0x212   : > { %987 = vst [vmem:[%s2088_s19 + $0x58] sm:$0xff] %v971_v8  ;;  %v1001_v61 = vld [vmem:[%s2088_s19 + $0x28] sm:$0xff] (!%p1426_p1)  ;;  %v1002_v8 = vld [vmem:[%s2088_s19 + $0x30] sm:$0xff] (!%p1426_p1) }
 0x213   : > { %985 = vst [vmem:[%s2088_s19 + $0x48] sm:$0xff] %v969_v9  ;;  %v1501_v11 = vpop.f32.mrb[12].mxu1 }
 0x214   : > { %v954_v12 = vadd.f32 %v1533_v59, %v1501_v11  ;;  %v848_v14 = vpop.f32.mrb[13].mxu1  ;;  %1065 = vperm.xlu1 (!%p1426_p1), %1663, %v1019_v33   ;;  %1060 = vperm.xlu0 (!%p1426_p1), %1662, %v1018_v34   ;;  %v1147_v11 = vld [vmem:[%s2065_s15 + $0x38] sm:$0xff] (!%p1426_p1)  ;;  %v1150_v33 = vld [vmem:[%s2065_s15 + $0x50] sm:$0xff] (!%p1426_p1) }
 0x215   : > { %v946_v15 = vadd.f32 %v945_v63, %v848_v14  ;;  %v1502_v17 = vpop.f32.mrb[14].mxu1  ;;  %995 = sbr.rel (%p1426_p1) target bundleno = 681 (0x2a9), region = 93 }
 0x216   : > { %v974_v18 = vadd.f32 %v954_v12, %v716_v10  ;;  %v957_v19 = vadd.f32 %v1534_v4, %v1502_v17  ;;  %v851_v21 = vpop.f32.mrb[15].mxu1 }
 0x217   : > { %v972_v22 = vadd.f32 %v946_v15, %v714_v13  ;;  %v949_v23 = vadd.f32 %v948_v7, %v851_v21  ;;  %v1003_v7 = vld [vmem:[%s2088_s19 + $0x38] sm:$0xff] (!%p1426_p1)  ;;  %v1146_v13 = vld [vmem:[%s2065_s15 + $0x30] sm:$0xff] (!%p1426_p1)  ;;  %v1149_v21 = vld [vmem:[%s2065_s15 + $0x48] sm:$0xff] (!%p1426_p1) }
 0x218   : > { %990 = vst [vmem:[%s2088_s19 + $0x70] sm:$0xff] %v974_v18  ;;  %v975_v24 = vadd.f32 %v957_v19, %v717_v16  ;;  %1075 = vperm.xlu1 (!%p1426_p1), %1663, %v1021_v35   ;;  %1070 = vperm.xlu0 (!%p1426_p1), %1662, %v1020_v36   ;;  %v1004_v18 = vld [vmem:[%s2088_s19 + $0x40] sm:$0xff] (!%p1426_p1)  ;;  %v1006_v28 = vld [vmem:[%s2088_s19 + $0x50] sm:$0xff] (!%p1426_p1) }
 0x219   : > { %988 = vst [vmem:[%s2088_s19 + $0x60] sm:$0xff] %v972_v22  ;;  %v973_v25 = vadd.f32 %v949_v23, %v715_v20  ;;  %v1148_v23 = vld [vmem:[%s2065_s15 + $0x40] sm:$0xff] (!%p1426_p1)  ;;  %v1007_v27 = vld [vmem:[%s2088_s19 + $0x58] sm:$0xff] (!%p1426_p1) }
 0x21a   : > { %991 = vst [vmem:[%s2088_s19 + $0x78] sm:$0xff] %v975_v24  ;;  %v1005_v17 = vld [vmem:[%s2088_s19 + $0x48] sm:$0xff] (!%p1426_p1) }
 0x21b   : > { %989 = vst [vmem:[%s2088_s19 + $0x68] sm:$0xff] %v973_v25 }
 0x21c   : > { %1085 = vperm.xlu1 %1663, %v1023_v37   ;;  %1080 = vperm.xlu0 %1662, %v1022_v38  }
 0x220   : > { %1095 = vperm.xlu1 %1663, %v1025_v39   ;;  %1090 = vperm.xlu0 %1662, %v1024_v40   ;;  %v1008_v38 = vld [vmem:[%s2088_s19 + $0x60] sm:$0xff] }
 0x222   : > { %v1009_v37 = vld [vmem:[%s2088_s19 + $0x68] sm:$0xff] }
 0x224   : > { %1105 = vperm.xlu1 %1663, %v1027_v41   ;;  %1100 = vperm.xlu0 %1662, %v1026_v42   ;;  %v1153_v41 = vld [vmem:[%s2065_s15 + $0x68] sm:$0xff] }
 0x287   : > { %v1041_v46 = vpop.permute.xlu1 %1040  ;;  %v1031_v48 = vpop.permute.xlu0 %1030 }
 0x288   : > { %v1110_v49 = vmul.f32 %v1041_v46, %v998_v43  ;;  %v1108_v50 = vmul.f32 %v1031_v48, %v996_v44  ;;  %v1152_v43 = vld [vmem:[%s2065_s15 + $0x60] sm:$0xff]  ;;  %v1010_v48 = vld [vmem:[%s2088_s19 + $0x70] sm:$0xff] }
 0x28a   : > { %1126 = vst [vmem:[%s2088_s19 + $0x10] sm:$0xff] %v1110_v49  ;;  %v1158_v53 = vadd.f32 %v1142_v45, %v1110_v49  ;;  %1124 = vst [vmem:[%s2088_s19] sm:$0xff] %v1108_v50  ;;  %v1156_v54 = vadd.f32 %v1140_v47, %v1108_v50  ;;  %v1011_v47 = vld [vmem:[%s2088_s19 + $0x78] sm:$0xff] }
 0x28b   : > { %v1046_v56 = vpop.permute.xlu1 %1045  ;;  %v1036_v58 = vpop.permute.xlu0 %1035 }
 0x28c   : > { %1174 = vst [vmem:[%s2090_s23 + $0x10] sm:$0xff] %v1158_v53  ;;  %1172 = vst [vmem:[%s2090_s23] sm:$0xff] %v1156_v54  ;;  %v1111_v59 = vmul.f32 %v1046_v56, %v999_v51  ;;  %v1109_v60 = vmul.f32 %v1036_v58, %v997_v52  ;;  %v1155_v51 = vld [vmem:[%s2065_s15 + $0x78] sm:$0xff]  ;;  %v1154_v53 = vld [vmem:[%s2065_s15 + $0x70] sm:$0xff] }
 0x28e   : > { %1127 = vst [vmem:[%s2088_s19 + $0x18] sm:$0xff] %v1111_v59  ;;  %v1159_v63 = vadd.f32 %v1143_v55, %v1111_v59  ;;  %1125 = vst [vmem:[%s2088_s19 + $0x8] sm:$0xff] %v1109_v60  ;;  %v1157_v0 = vadd.f32 %v1141_v57, %v1109_v60 }
 0x28f   : > { %v1056_v2 = vpop.permute.xlu1 %1055  ;;  %v1051_v4 = vpop.permute.xlu0 %1050 }
 0x290   : > { %1175 = vst [vmem:[%s2090_s23 + $0x18] sm:$0xff] %v1159_v63  ;;  %1173 = vst [vmem:[%s2090_s23 + $0x8] sm:$0xff] %v1157_v0  ;;  %v1113_v5 = vmul.f32 %v1056_v2, %v1001_v61  ;;  %v1112_v6 = vmul.f32 %v1051_v4, %v1000_v62 }
 0x292   : > { %1129 = vst [vmem:[%s2088_s19 + $0x28] sm:$0xff] %v1113_v5  ;;  %v1161_v9 = vadd.f32 %v1145_v1, %v1113_v5  ;;  %1128 = vst [vmem:[%s2088_s19 + $0x20] sm:$0xff] %v1112_v6  ;;  %v1160_v10 = vadd.f32 %v1144_v3, %v1112_v6 }
 0x293   : > { %v1066_v12 = vpop.permute.xlu1 %1065  ;;  %v1061_v14 = vpop.permute.xlu0 %1060 }
 0x294   : > { %1177 = vst [vmem:[%s2090_s23 + $0x28] sm:$0xff] %v1161_v9  ;;  %1176 = vst [vmem:[%s2090_s23 + $0x20] sm:$0xff] %v1160_v10  ;;  %v1115_v15 = vmul.f32 %v1066_v12, %v1003_v7  ;;  %v1114_v16 = vmul.f32 %v1061_v14, %v1002_v8 }
 0x296   : > { %1131 = vst [vmem:[%s2088_s19 + $0x38] sm:$0xff] %v1115_v15  ;;  %v1163_v19 = vadd.f32 %v1147_v11, %v1115_v15  ;;  %1130 = vst [vmem:[%s2088_s19 + $0x30] sm:$0xff] %v1114_v16  ;;  %v1162_v20 = vadd.f32 %v1146_v13, %v1114_v16 }
 0x297   : > { %v1076_v22 = vpop.permute.xlu1 %1075  ;;  %v1071_v24 = vpop.permute.xlu0 %1070 }
 0x298   : > { %1179 = vst [vmem:[%s2090_s23 + $0x38] sm:$0xff] %v1163_v19  ;;  %1178 = vst [vmem:[%s2090_s23 + $0x30] sm:$0xff] %v1162_v20  ;;  %v1117_v25 = vmul.f32 %v1076_v22, %v1005_v17  ;;  %v1116_v26 = vmul.f32 %v1071_v24, %v1004_v18 }
 0x29a   : > { %1133 = vst [vmem:[%s2088_s19 + $0x48] sm:$0xff] %v1117_v25  ;;  %v1165_v29 = vadd.f32 %v1149_v21, %v1117_v25  ;;  %1132 = vst [vmem:[%s2088_s19 + $0x40] sm:$0xff] %v1116_v26  ;;  %v1164_v30 = vadd.f32 %v1148_v23, %v1116_v26 }
 0x29b   : > { %v1086_v32 = vpop.permute.xlu1 %1085  ;;  %v1081_v34 = vpop.permute.xlu0 %1080 }
 0x29c   : > { %1181 = vst [vmem:[%s2090_s23 + $0x48] sm:$0xff] %v1165_v29  ;;  %1180 = vst [vmem:[%s2090_s23 + $0x40] sm:$0xff] %v1164_v30  ;;  %v1119_v35 = vmul.f32 %v1086_v32, %v1007_v27  ;;  %v1118_v36 = vmul.f32 %v1081_v34, %v1006_v28 }
 0x29e   : > { %1135 = vst [vmem:[%s2088_s19 + $0x58] sm:$0xff] %v1119_v35  ;;  %v1167_v39 = vadd.f32 %v1151_v31, %v1119_v35  ;;  %1134 = vst [vmem:[%s2088_s19 + $0x50] sm:$0xff] %v1118_v36  ;;  %v1166_v40 = vadd.f32 %v1150_v33, %v1118_v36 }
 0x29f   : > { %v1096_v42 = vpop.permute.xlu1 %1095  ;;  %v1091_v44 = vpop.permute.xlu0 %1090 }
 0x2a0   : > { %1183 = vst [vmem:[%s2090_s23 + $0x58] sm:$0xff] %v1167_v39  ;;  %1182 = vst [vmem:[%s2090_s23 + $0x50] sm:$0xff] %v1166_v40  ;;  %v1121_v45 = vmul.f32 %v1096_v42, %v1009_v37  ;;  %v1120_v46 = vmul.f32 %v1091_v44, %v1008_v38 }
 0x2a2   : > { %1137 = vst [vmem:[%s2088_s19 + $0x68] sm:$0xff] %v1121_v45  ;;  %v1169_v49 = vadd.f32 %v1153_v41, %v1121_v45  ;;  %1136 = vst [vmem:[%s2088_s19 + $0x60] sm:$0xff] %v1120_v46  ;;  %v1168_v50 = vadd.f32 %v1152_v43, %v1120_v46 }
 0x2a3   : > { %v1106_v52 = vpop.permute.xlu1 %1105  ;;  %v1101_v54 = vpop.permute.xlu0 %1100 }
 0x2a4   : > { %1185 = vst [vmem:[%s2090_s23 + $0x68] sm:$0xff] %v1169_v49  ;;  %1184 = vst [vmem:[%s2090_s23 + $0x60] sm:$0xff] %v1168_v50  ;;  %v1123_v55 = vmul.f32 %v1106_v52, %v1011_v47  ;;  %v1122_v56 = vmul.f32 %v1101_v54, %v1010_v48 }
 0x2a6   : > { %1139 = vst [vmem:[%s2088_s19 + $0x78] sm:$0xff] %v1123_v55  ;;  %v1171_v57 = vadd.f32 %v1155_v51, %v1123_v55  ;;  %1138 = vst [vmem:[%s2088_s19 + $0x70] sm:$0xff] %v1122_v56  ;;  %v1170_v58 = vadd.f32 %v1154_v53, %v1122_v56 }
 0x2a8   : > { %1187 = vst [vmem:[%s2090_s23 + $0x78] sm:$0xff] %v1171_v57  ;;  %1186 = vst [vmem:[%s2090_s23 + $0x70] sm:$0xff] %v1170_v58 }
 0x2a9 PF: > { %s1437_s4 = sshll.u32 %s1826_s27, 11  ;;  %s1207_s28 = sshll.u32 %s2088_s19, 4  ;;  %s2271_s28 = int_to_ptr.vmem [resolvable:$true] %s1207_s28 }
 0x2aa   : > { %s2268_s10 = scalar_lea.hbm %s2376_s5, %s1437_s4  ;;  %s1189_s15 = scalar_lea.sflag [#allocation5], %s2059_s14 }
 0x2ab   : > { %s1692_s17 = scalar_lea.vmem %s2271_s28, 2048  ;;  %p2402_p0 = scmp.ne.s32.totalorder %s2398_s9, 0 }
 0x2ac   : > { %p1693_p11 = scmp.ne.s32.totalorder %s2271_s28, %s1692_s17  ;;  %s1846_s24 = smov [#allocation6]  }
 0x2ad   : > { %s1696_s20 = sshll.u32 %s1846_s24, 4  ;;  %s1697_s20 = int_to_ptr.vmem [resolvable:$false] %s1696_s20 }
 0x2ae   : > { %p1694_p2 = pnand %p1693_p11, %p2402_p0  ;;  %s1698_s29 = scalar_lea.vmem %s1697_s20, 4096 }
 0x2af   : > { %p1699_p4 = scmp.lt.s32.totalorder %s2271_s28, %s1697_s20  ;;  %p1700_p6 = scmp.lt.s32.totalorder %s1698_s29, %s1692_s17 }
 0x2b0   : > { %p1695_p3 = pneg %p1694_p2 }
 0x2b1   : > { %p1701_p8 = por %p1700_p6, %p1699_p4 }
 0x2b3   : > { %p1702_p5 = pnand %p1701_p8, %p1695_p3 }
 0x2b5   : > { %1705 = shalt.err (!%p1702_p5)
}
 0x2b6   : > { %s1706_s19 = scalar_lea.hbm %s2268_s10, 2048  ;;  %s1710_s13 = scalar_lea.hbm %s2376_s5, 4096 }
 0x2b7   : > { %p1707_p9 = scmp.ne.s32.totalorder %s2268_s10, %s1706_s19  ;;  %p1711_p13 = scmp.lt.u32.totalorder %s2268_s10, %s2376_s5 }
 0x2b8   : > { %p1712_p12 = scmp.lt.u32.totalorder %s1710_s13, %s1706_s19  ;;  %p1714_p11 = scmp.lt.u32.totalorder %s1706_s19, %s2268_s10 }
 0x2b9   : > { %p1708_p10 = pnand %p1707_p9, %p2402_p0 }
 0x2ba   : > { %p1713_p1 = por %p1712_p12, %p1711_p13 }
 0x2bb   : > { %p1709_p7 = pneg %p1708_p10 }
 0x2bc   : > { %p1715_p2 = por %p1714_p11, %p1713_p1 }
 0x2be   : > { %p1716_p3 = pnand %p1715_p2, %p1709_p7 }
 0x2c0   : > { %1719 = shalt.err (!%p1716_p3)
}
 0x2c1   : > { %s1847_s18 = smov 128   ;;  %s1848_s0 = smov 8  }
 0x2c2   : > { %1553 = dma.vmem_to_hbm [thread:$0]  (%p2402_p0), %s2271_s28, 2048, %s2268_s10, %s1189_s15, %s1847_s18, %s1847_s18, %s1848_s0  }
 0x2c3   : > { %s2305_s17 = scalar_lea.hbm %s2377_s6, %s1437_s4  ;;  %s1223_s24 = sshll.u32 %s2090_s23, 4  ;;  %s2308_s24 = int_to_ptr.vmem [resolvable:$true] %s1223_s24 }
 0x2c4   : > { %s1194_s20 = scalar_lea.sflag [#allocation8], %s2059_s14  ;;  %s1720_s29 = scalar_lea.vmem %s2308_s24, 2048 }
 0x2c5   : > { %p1721_p4 = scmp.ne.s32.totalorder %s2308_s24, %s1720_s29  ;;  %s1849_s19 = smov [#allocation7]  }
 0x2c6   : > { %s1724_s10 = sshll.u32 %s1849_s19, 4  ;;  %s1725_s10 = int_to_ptr.vmem [resolvable:$false] %s1724_s10 }
 0x2c7   : > { %p1722_p6 = pnand %p1721_p4, %p2402_p0  ;;  %s1726_s27 = scalar_lea.vmem %s1725_s10, 4096 }
 0x2c8   : > { %p1727_p5 = scmp.lt.s32.totalorder %s2308_s24, %s1725_s10  ;;  %p1728_p9 = scmp.lt.s32.totalorder %s1726_s27, %s1720_s29 }
 0x2c9   : > { %p1723_p8 = pneg %p1722_p6 }
 0x2ca   : > { %p1729_p10 = por %p1728_p9, %p1727_p5 }
 0x2cc   : > { %p1730_p7 = pnand %p1729_p10, %p1723_p8 }
 0x2ce   : > { %1733 = shalt.err (!%p1730_p7)
}
 0x2cf   : > { %s1734_s23 = scalar_lea.hbm %s2305_s17, 2048  ;;  %s1738_s15 = scalar_lea.hbm %s2377_s6, 4096 }
 0x2d0   : > { %p1735_p13 = scmp.ne.s32.totalorder %s2305_s17, %s1734_s23  ;;  %p1739_p11 = scmp.lt.u32.totalorder %s2305_s17, %s2377_s6 }
 0x2d1   : > { %p1740_p2 = scmp.lt.u32.totalorder %s1738_s15, %s1734_s23  ;;  %p1742_p4 = scmp.lt.u32.totalorder %s1734_s23, %s2305_s17 }
 0x2d2   : > { %p1736_p12 = pnand %p1735_p13, %p2402_p0 }
 0x2d3   : > { %p1741_p3 = por %p1740_p2, %p1739_p11 }
 0x2d4   : > { %p1737_p1 = pneg %p1736_p12 }
 0x2d5   : > { %p1743_p6 = por %p1742_p4, %p1741_p3 }
 0x2d7   : > { %p1744_p8 = pnand %p1743_p6, %p1737_p1 }
 0x2d9   : > { %1747 = shalt.err (!%p1744_p8)
}
 0x2da   : > { %1554 = dma.vmem_to_hbm [thread:$0]  (%p2402_p0), %s2308_s24, 2048, %s2305_s17, %s1194_s20, %s1847_s18, %s1847_s18, %s1848_s0  }
 0x2db PF: > { %p1564_p5 = scmp.ge.s32.totalorder %s1838_s30, 2  ;;  %s1238_s13 = sand.u32 1, %s1802_s21  }
 0x2dc   : > { %p2403_p9 = scmp.ne.s32.totalorder %s2399_s7, 0  ;;  %s1239_s11 = scalar_lea.sflag [#allocation5], %s1238_s13 }
 0x2de   : > { %p1558_p10 = pnand %p1564_p5, %p2403_p9 }
 0x2e0   : > { %1793 = dma.done.wait (!%p1558_p10), %s1239_s11, 2048  }
 0x2e1   : > { %1795 = vsyncadd (!%p1558_p10), %s1239_s11, 4294965248  ;;  %s1248_s9 = scalar_lea.sflag [#allocation8], %s1238_s13 }
 0x2e2   : > { %1797 = dma.done.wait (!%p1558_p10), %s1248_s9, 2048  }
 0x2e3   : > { %1799 = vsyncadd (!%p1558_p10), %s1248_s9, 4294965248  ;;  %s26_s30 = sadd.s32 1, %s1838_s30   ;;  %s2404_s14 = sld [smem:[#allocation12_spill]] }
 0x2e4   : > { %p23_p7 = scmp.ge.s32.totalorder %s26_s30, 6   ;;  %s2405_s23 = sld [smem:[#allocation18_spill]] }
 0x2e5   : > { %s2406_s24 = sld [smem:[#allocation13_spill]]  ;;  %s2407_s25 = sld [smem:[#allocation19_spill]] }
 0x2e6   : > { %s2408_s26 = sld [smem:[#allocation14_spill]]  ;;  %s2409_s27 = sld [smem:[#allocation15_spill]] }
 0x2e7   : > { %s2410_s28 = sld [smem:[#allocation16_spill]]  ;;  %s2411_s29 = sld [smem:[#allocation17_spill]] }
 0x2e8   : > { %s2412_s21 = smov %s1806_s22  ;;  %25 = sbr.rel (!%p23_p7) target bundleno = 13 (0xd), region = 168 }
 0x2e9   : > { %s2413_s22 = smov %s2404_s14 }
 0x2ef   :  { %1253 = vsyncpa [#allocation4], 1 }
 0x2f0   :  { %1255 = vsyncpa [#allocation4 + $0x1], 1 }
 0x2f1   :  { %1256 = vsyncpa [#allocation5], 1 }
 0x2f2   :  { %1258 = vsyncpa [#allocation5 + $0x1], 1 }
 0x2f3   :  { %1259 = vsyncpa [#allocation8], 1 }
 0x2f4   :  { %1261 = vsyncpa [#allocation8 + $0x1], 1 }

</bundles_post_ra>
